<compile_context>
chip_gen: v5e
topology: v5e:2x2
jax: 0.10.0
libtpu: 0.0.40
codegen_flags: <defaults>
</compile_context>

<pallas_src>
import functools

import jax
import jax.numpy as jnp
from jax.experimental import pallas as pl
from jax.experimental.pallas import tpu as pltpu

MVALUE = 99.0 / 35.0   # Python float -> weak-typed, compares in the source dtype
LANES = 128
SUBLANES = 8


def _masked_mae_sum_kernel(x_ref, t_ref, o_ref, *, steps_per_core, eff_tile,
                           rows_total, apply_row_mask):
    # Grid = (cores, steps). o_ref is a (1, 8, 128) partial-sum block resident
    # across the (last, "arbitrary") step axis; init on step 0, accumulate
    # vreg-wise every step. Final scalar reduce happens in the wrapper.
    c = pl.program_id(0)
    i = pl.program_id(1)

    @pl.when(i == 0)
    def _():
        o_ref[...] = jnp.zeros_like(o_ref)

    x = x_ref[...]
    t = t_ref[...]
    # Sentinel compare in the source dtype (matches PyTorch `targets != 99/35`).
    keep = t != MVALUE
    # mask*(x-t) with mask in {0,1}  ==  where(t != mvalue, |x-t|, 0); f32 accum.
    diff = jnp.where(keep,
                     jnp.abs(x.astype(jnp.float32) - t.astype(jnp.float32)),
                     jnp.float32(0.0))

    if apply_row_mask:
        # Rows past the end of the real data must contribute zero. This covers
        # (a) the ragged last block (Pallas pads it with unspecified data) and
        # (b) per-core overshoot steps when steps don't split evenly across
        # TensorCores. Only the step(s) that actually need it pay the cost.
        gstep = c * steps_per_core + i
        rows_left = rows_total - gstep * eff_tile

        @pl.when(rows_left < eff_tile)
        def _():
            row_id = jax.lax.broadcasted_iota(jnp.int32, diff.shape, 0)
            masked = jnp.where(row_id < rows_left, diff, jnp.float32(0.0))
            o_ref[0] += masked.reshape(-1, SUBLANES, LANES).sum(axis=0)

        @pl.when(jnp.logical_not(rows_left < eff_tile))
        def _():
            o_ref[0] += diff.reshape(-1, SUBLANES, LANES).sum(axis=0)
    else:
        # (tile, 128) -> (tile/8, 8, 128): layout-preserving sublane split;
        # sum(axis=0) streams pure-VPU vreg adds into one (8,128) accumulator.
        o_ref[0] += diff.reshape(-1, SUBLANES, LANES).sum(axis=0)


def _num_tensorcores():
    # v7x has 2 TensorCores per chip; v5e/v6e have 1.
    try:
        kind = jax.devices()[0].device_kind.lower()
    except Exception:
        return 1
    return 2 if "v7" in kind else 1


def custom_mae(inputs, targets, *, tile_rows=8192):
    """Masked MAE matching CustomMAE.forward. inputs/targets: same shape, any rank."""
    assert inputs.shape == targets.shape
    n_elems = inputs.size  # L1Loss 'mean' divides by ALL elements

    x = inputs.reshape(-1)   # native dtype: no wrapper-side astype copies
    t = targets.reshape(-1)
    n = x.shape[0]

    rows_total = n // LANES
    n_main = rows_total * LANES

    if rows_total > 0:
        # Tile rows must be a multiple of 8 (sublane) for the vreg accumulation.
        tile_rows = max(SUBLANES, (int(tile_rows) // SUBLANES) * SUBLANES)
        eff_tile = min(tile_rows, pl.cdiv(rows_total, SUBLANES) * SUBLANES)

        num_steps = pl.cdiv(rows_total, eff_tile)
        num_cores = min(_num_tensorcores(), num_steps)
        steps_per_core = pl.cdiv(num_steps, num_cores)

        # Row mask needed unless the (cores x steps) grid covers rows_total exactly.
        apply_row_mask = (num_cores * steps_per_core * eff_tile) != rows_total
        # Clamp only needed when a core's step range overshoots (odd split on 2 TCs).
        needs_clamp = (num_cores * steps_per_core) > num_steps

        # Only a <128-element remainder ever leaves the kernel path; when n is a
        # multiple of 128 this is the original buffer (no copy).
        x_main = (x if n_main == n else x[:n_main]).reshape(rows_total, LANES)
        t_main = (t if n_main == n else t[:n_main]).reshape(rows_total, LANES)

        def in_map(c, i):
            g = c * steps_per_core + i
            if needs_clamp:
                # Keep the DMA in-bounds; overshoot steps are zeroed in-kernel.
                g = jnp.minimum(g, num_steps - 1)
            return (g, 0)

        # Pure-DMA kernel: a third buffer hides DMA issue/completion jitter.
        use_triple = steps_per_core >= 3
        if use_triple:
            in_spec = pl.BlockSpec((eff_tile, LANES), in_map,
                                   pipeline_mode=pl.Buffered(3))
        else:
            in_spec = pl.BlockSpec((eff_tile, LANES), in_map)

        bytes_per_row = LANES * (x_main.dtype.itemsize + t_main.dtype.itemsize)
        block_bytes = eff_tile * bytes_per_row
        bufs = 3 if use_triple else 2
        # 32 MiB covers triple-buffered 8192-row f32 blocks and is safe on every
        # generation (v7x physical VMEM is 64 MiB; v5e/v6e have 128 MiB).
        vmem_limit = max(bufs * block_bytes + (2 << 20), 32 << 20)

        kernel = functools.partial(
            _masked_mae_sum_kernel,
            steps_per_core=steps_per_core,
            eff_tile=eff_tile,
            rows_total=rows_total,
            apply_row_mask=apply_row_mask,
        )

        cost = pl.CostEstimate(
            flops=5 * n_main,
            transcendentals=0,
            bytes_accessed=rows_total * bytes_per_row
            + num_cores * SUBLANES * LANES * 4,
        )

        if num_cores > 1:
            # Real 2-TensorCore split on v7x.
            dim_sem = (pltpu.CORE_PARALLEL, pltpu.ARBITRARY)
        else:
            dim_sem = ("parallel", "arbitrary")

        partials = pl.pallas_call(
            kernel,
            out_shape=jax.ShapeDtypeStruct((num_cores, SUBLANES, LANES), jnp.float32),
            grid_spec=pltpu.PrefetchScalarGridSpec(
                num_scalar_prefetch=0,
                grid=(num_cores, steps_per_core),
                in_specs=[in_spec, in_spec],
                out_specs=pl.BlockSpec((1, SUBLANES, LANES), lambda c, i: (c, 0, 0)),
            ),
            compiler_params=pltpu.CompilerParams(
                dimension_semantics=dim_sem,
                vmem_limit_bytes=int(vmem_limit),
            ),
            cost_estimate=cost,
        )(x_main, t_main)
        main_sum = jnp.sum(partials)
    else:
        main_sum = jnp.float32(0.0)

    if n_main < n:
        # Sub-lane remainder (< 128 elements): same masked-diff math in plain jnp.
        x_tail = x[n_main:]
        t_tail = t[n_main:]
        tail_sum = jnp.sum(jnp.where(
            t_tail != MVALUE,
            jnp.abs(x_tail.astype(jnp.float32) - t_tail.astype(jnp.float32)),
            jnp.float32(0.0)))
        total = main_sum + tail_sum
    else:
        total = main_sum

    return (total / n_elems).astype(jnp.float32)


def _reference(inputs, targets):
    mask = (targets != MVALUE).astype(jnp.float32)
    return jnp.mean(jnp.abs(inputs * mask - targets * mask))


if __name__ == "__main__":
    key = jax.random.PRNGKey(0)
    k1, k2, k3 = jax.random.split(key, 3)

    B, C, H, W = 2, 4, 16, 16
    inputs = jax.random.normal(k1, (B, C, H, W), dtype=jnp.float32)
    targets = jax.random.normal(k2, (B, C, H, W), dtype=jnp.float32)

    # Plant some exact "missing value" entries so the mask path is exercised.
    missing = jax.random.bernoulli(k3, 0.2, (B, C, H, W))
    targets = jnp.where(missing, jnp.float32(MVALUE), targets)

    mae = jax.jit(custom_mae)   # fuse tail reduce / partial-sum / divide
    out = mae(inputs, targets)
    out = jax.block_until_ready(out)

    ref = _reference(inputs, targets)
    assert jnp.allclose(out, ref, rtol=1e-5, atol=1e-6), (out, ref)

    print("KERNEL_OK")
</pallas_src>

<mosaic_0001>
module attributes {stable_mosaic.version = 11 : i64} {
  func.func @_masked_mae_sum_kernel(%arg0: i32, %arg1: i32, %arg2: memref<16x128xf32, #tpu.memory_space<vmem>>, %arg3: memref<16x128xf32, #tpu.memory_space<vmem>>, %arg4: memref<1x8x128xf32, #tpu.memory_space<vmem>>) attributes {dimension_semantics = [#tpu.dimension_semantics<parallel>, #tpu.dimension_semantics<arbitrary>], iteration_bounds = array<i64: 1, 1>, scalar_prefetch = 0 : i64, scratch_operands = 0 : i64, tpu.core_type = #tpu.core_type<tc>, window_params = [{transform_indices = @transform_0, window_bounds = array<i64: 16, 128>}, {transform_indices = @transform_1, window_bounds = array<i64: 16, 128>}, {transform_indices = @transform_2, window_bounds = array<i64: 1, 8, 128>}]} {
    %c0_i32 = arith.constant 0 : i32
    %0 = arith.cmpi eq, %arg1, %c0_i32 : i32
    %1 = arith.extui %0 : i1 to i32
    %c0_i32_0 = arith.constant 0 : i32
    %2 = arith.cmpi ne, %1, %c0_i32_0 : i32
    scf.if %2 {
      %cst_12 = arith.constant 0.000000e+00 : f32
      %19 = vector.broadcast %cst_12 : f32 to vector<1x8x128xf32>
      %c0_13 = arith.constant 0 : index
      %c0_14 = arith.constant 0 : index
      %c0_15 = arith.constant 0 : index
      %20 = vector.load %arg4[%c0_13, %c0_14, %c0_15] : memref<1x8x128xf32, #tpu.memory_space<vmem>>, vector<1x8x128xf32>
      tpu.vector_store %arg4[%c0_13, %c0_14, %c0_15], %19 {strides = array<i32>} : memref<1x8x128xf32, #tpu.memory_space<vmem>>, vector<1x8x128xf32>,
    } else {
    }
    %c0 = arith.constant 0 : index
    %c0_1 = arith.constant 0 : index
    %3 = vector.load %arg2[%c0, %c0_1] : memref<16x128xf32, #tpu.memory_space<vmem>>, vector<16x128xf32>
    %c0_2 = arith.constant 0 : index
    %c0_3 = arith.constant 0 : index
    %4 = vector.load %arg3[%c0_2, %c0_3] : memref<16x128xf32, #tpu.memory_space<vmem>>, vector<16x128xf32>
    %cst = arith.constant 2.82857132 : f32
    %5 = vector.broadcast %cst : f32 to vector<16x128xf32>
    %6 = arith.cmpf one, %4, %5 : vector<16x128xf32>
    %7 = arith.subf %3, %4 : vector<16x128xf32>
    %8 = math.absf %7 : vector<16x128xf32>
    %cst_4 = arith.constant 0.000000e+00 : f32
    %9 = vector.broadcast %cst_4 : f32 to vector<16x128xf32>
    %10 = arith.select %6, %8, %9 : vector<16x128xi1>, vector<16x128xf32>
    %c0_5 = arith.constant 0 : index
    %c0_6 = arith.constant 0 : index
    %c0_7 = arith.constant 0 : index
    %11 = vector.load %arg4[%c0_5, %c0_6, %c0_7] : memref<1x8x128xf32, #tpu.memory_space<vmem>>, vector<1x8x128xf32>
    %12 = vector.shape_cast %11 : vector<1x8x128xf32> to vector<8x128xf32>
    %13 = vector.shape_cast %10 : vector<16x128xf32> to vector<2x8x128xf32>
    %cst_8 = arith.constant dense<0.000000e+00> : vector<8x128xf32>
    %14 = vector.multi_reduction <add>, %13, %cst_8 [0] : vector<2x8x128xf32> to vector<8x128xf32>
    %15 = arith.addf %12, %14 : vector<8x128xf32>
    %c0_9 = arith.constant 0 : index
    %c0_10 = arith.constant 0 : index
    %c0_11 = arith.constant 0 : index
    %16 = vector.load %arg4[%c0_9, %c0_10, %c0_11] : memref<1x8x128xf32, #tpu.memory_space<vmem>>, vector<1x8x128xf32>
    %17 = vector.shape_cast %16 : vector<1x8x128xf32> to vector<8x128xf32>
    %18 = vector.shape_cast %15 : vector<8x128xf32> to vector<1x8x128xf32>
    tpu.vector_store %arg4[%c0_9, %c0_10, %c0_11], %18 {strides = array<i32>} : memref<1x8x128xf32, #tpu.memory_space<vmem>>, vector<1x8x128xf32>,
    return
  }
  func.func @transform_0(%arg0: i32, %arg1: i32) -> (i32, i32) {
    %c1_i32 = arith.constant 1 : i32
    %0 = arith.muli %arg0, %c1_i32 : i32
    %1 = arith.addi %0, %arg1 : i32
    %c0_i32 = arith.constant 0 : i32
    %c0_i32_0 = arith.constant 0 : i32
    return %1, %c0_i32 : i32, i32
  }
  func.func @transform_1(%arg0: i32, %arg1: i32) -> (i32, i32) {
    %c1_i32 = arith.constant 1 : i32
    %0 = arith.muli %arg0, %c1_i32 : i32
    %1 = arith.addi %0, %arg1 : i32
    %c0_i32 = arith.constant 0 : i32
    %c0_i32_0 = arith.constant 0 : i32
    return %1, %c0_i32 : i32, i32
  }
  func.func @transform_2(%arg0: i32, %arg1: i32) -> (i32, i32, i32) {
    %c0_i32 = arith.constant 0 : i32
    %c0_i32_0 = arith.constant 0 : i32
    %c0_i32_1 = arith.constant 0 : i32
    return %arg0, %c0_i32, %c0_i32_0 : i32, i32, i32
  }
}

</mosaic_0001>

<bundles_post_ra>
// kernel: custom_mae.1
= control target key start
LH: loop header
LB: loop body
LE: loop exit
PB: predicated region body
PF: predicated region fallthrough
CT: control target
= control target key end

     0   :  { %s123_s0 = inlined_call_operand.vmem [shape: f32[16,128], index: 0, kind: input, shape index: {}]   ;;  %s124_s1 = inlined_call_operand.vmem [shape: f32[16,128], index: 1, kind: input, shape index: {}]   ;;  %s125_s2 = inlined_call_operand.vmem [shape: f32[1,8,128], index: 2, kind: output, shape index: {}]  }
   0x1   :  { %v60_v0 = vld [vmem:[%s123_s0] sm:$0xff]  ;;  %v61_v1 = vld [vmem:[%s123_s0 + $0x8] sm:$0xff] }
   0x2   :  { %v62_v2 = vld [vmem:[%s124_s1] sm:$0xff]  ;;  %v63_v3 = vld [vmem:[%s124_s1 + $0x8] sm:$0xff] }
   0x3   :  { %v66_v4 = vsub.f32 %v60_v0, %v62_v2  ;;  %vm64_vm0 = vcmp.ne.f32.partialorder %v62_v2, 2.8285713  ;;  %v67_v5 = vsub.f32 %v61_v1, %v63_v3  ;;  %vm65_vm1 = vcmp.ne.f32.partialorder %v63_v3, 2.8285713 }
   0x5   :  { %v68_v6 = vand.u32 2147483647, %v66_v4  ;;  %v69_v7 = vand.u32 2147483647, %v67_v5 }
   0x7   :  { %v70_v8 = vsel %vm64_vm0, %v68_v6, 0.0  ;;  %v71_v9 = vsel %vm65_vm1, %v69_v7, 0.0 }
   0x8   :  { %v73_v10 = vadd.f32 %v71_v9, %v70_v8 }
   0xa   :  { %75 = vst [vmem:[%s125_s2] sm:$0xff] %v73_v10 }

</bundles_post_ra>
